<compile_context>
chip_gen: v6e
topology: v6e:2x2x1
jax: 0.10.0
libtpu: 0.0.40
codegen_flags: <defaults>
</compile_context>

<pallas_src>
import functools
import math

import jax
import jax.numpy as jnp
from jax import lax
from jax.experimental import pallas as pl
from jax.experimental.pallas import tpu as pltpu


# ----------------------------------------------------------------------------- #
# Kernel
# ----------------------------------------------------------------------------- #
def _head_kernel(x_ref, w1_ref, lnv_ref, w2_ref, b2_ref, o_ref, h_scratch,
                 *, eps, prologue_chunk):
    """Fused dense + GELU + LayerNorm (cached per row tile) + decoder matmul.

    Grid = (row_tiles, col_tiles).  The prologue only depends on the row tile,
    so it is computed when j == 0 (in row sub-chunks to bound vreg pressure)
    and stored bf16 in VMEM scratch; every column tile then does one MXU
    matmul against it.
    """
    j = pl.program_id(1)

    @pl.when(j == 0)
    def _():
        b1 = lnv_ref[0:1, :]
        gamma = lnv_ref[1:2, :]
        beta = lnv_ref[2:3, :]
        tm = h_scratch.shape[0]
        off = 0
        while off < tm:                       # static (trace-time) chunk loop
            sz = min(prologue_chunk, tm - off)
            # dense: bf16 x-chunk @ bf16 w1 with f32 accumulation, f32 bias.
            h = jnp.dot(x_ref[off:off + sz, :], w1_ref[...],
                        preferred_element_type=jnp.float32) + b1
            # exact GELU (torch.nn.GELU default): 0.5*x*(1+erf(x/sqrt(2)))
            h = 0.5 * h * (1.0 + lax.erf(h * 0.7071067811865476))
            # LayerNorm: two-pass variance (numerically safe) + clamp.
            mean = jnp.mean(h, axis=-1, keepdims=True)
            c = h - mean
            var = jnp.maximum(jnp.mean(c * c, axis=-1, keepdims=True), 0.0)
            h = c * lax.rsqrt(var + eps)
            h = h * gamma + beta
            # NOTE: h is cached bf16 (MXU-input precision) before the decoder
            # matmul; deliberate precision/perf tradeoff vs the f32 reference.
            h_scratch[off:off + sz, :] = h.astype(h_scratch.dtype)
            off += sz

    # decoder: bf16 h @ bf16 w2 column tile, f32 accumulation + f32 bias.
    o_ref[...] = (
        jnp.dot(h_scratch[...], w2_ref[...],
                preferred_element_type=jnp.float32) + b2_ref[...]
    ).astype(o_ref.dtype)


# ----------------------------------------------------------------------------- #
# Tiling helpers
# ----------------------------------------------------------------------------- #
def _round_up(x, m):
    return ((x + m - 1) // m) * m


def _pick_tile(total, block, align):
    """Pick (tile, padded_total): tile is a multiple of `align`, roughly
    <= `block`, padded_total % tile == 0, with minimal padding waste."""
    total_a = _round_up(max(int(total), 1), align)
    block = max(_round_up(int(block), align), align)
    # Prefer an exact aligned divisor of total_a near `block` (zero padding).
    d = min(block, total_a)
    best = None
    while d >= align:
        if total_a % d == 0:
            best = d
            break
        d -= align
    if best is not None and best * 2 >= block:
        return best, total_a
    # Fall back to balanced tiles with < `align` rows/cols of padding per tile.
    n_tiles = -(-total_a // block)
    tile = _round_up(-(-total_a // n_tiles), align)
    return tile, tile * n_tiles


def _spec(shape, index_map, buffers=None):
    """BlockSpec with optional explicit buffer count (graceful fallback)."""
    if buffers is None:
        return pl.BlockSpec(shape, index_map)
    try:
        return pl.BlockSpec(shape, index_map, pipeline_mode=pl.Buffered(buffers))
    except TypeError:
        return pl.BlockSpec(shape, index_map)


# ----------------------------------------------------------------------------- #
# One-time parameter preparation (pre-cast / pre-pad OUTSIDE the hot path)
# ----------------------------------------------------------------------------- #
def prepare_head_params(params, *, block_cols=512):
    """Cast weights to bf16, pad the vocab axis, pack LN vectors -- once."""
    H = params["w1"].shape[0]
    V = params["w2"].shape[1]
    tn, v_pad = _pick_tile(V, block_cols, 128)

    w2 = params["w2"]
    b2 = params["b2"]
    if v_pad != V:
        w2 = jnp.pad(w2, ((0, 0), (0, v_pad - V)))
        b2 = jnp.pad(b2, (0, v_pad - V))

    # Pack b1 / gamma / beta into one resident (8, H) block (rows 0..2 used):
    # a single DMA + single sublane-padded VMEM buffer instead of three.
    lnv = jnp.zeros((8, H), jnp.float32)
    lnv = lnv.at[0].set(params["b1"].astype(jnp.float32))
    lnv = lnv.at[1].set(params["gamma"].astype(jnp.float32))
    lnv = lnv.at[2].set(params["beta"].astype(jnp.float32))

    return {
        "H": H, "V": V, "tn": tn, "v_pad": v_pad,
        "w1": params["w1"].astype(jnp.bfloat16),
        "lnv": lnv,
        "w2": w2.astype(jnp.bfloat16),
        "b2": b2.reshape(1, v_pad).astype(jnp.float32),
    }


# ----------------------------------------------------------------------------- #
# Wrapper
# ----------------------------------------------------------------------------- #
def masked_img_token_prediction_head(x, prepared, *, eps,
                                     block_rows=512,
                                     prologue_chunk=128,
                                     w2_buffers=2,
                                     out_dtype=jnp.float32):
    """x: (..., H) f32.  Returns (..., V) in out_dtype (f32 default; pass
    jnp.bfloat16 to halve the output writeback stream if the consumer
    tolerates it)."""
    H, V = prepared["H"], prepared["V"]
    tn, v_pad = prepared["tn"], prepared["v_pad"]

    orig_lead = x.shape[:-1]
    R = int(math.prod(orig_lead)) if orig_lead else 1
    x2 = x.reshape(R, H)

    # Row tile: multiple of 8, near block_rows, minimal padding waste.
    tm, r_pad = _pick_tile(R, block_rows, 8)
    if r_pad != R:
        x2 = jnp.pad(x2, ((0, r_pad - R), (0, 0)))
    x_bf = x2.astype(jnp.bfloat16)

    grid = (r_pad // tm, v_pad // tn)
    out_itemsize = jnp.dtype(out_dtype).itemsize

    # VMEM budget (bytes) -> explicit limit with headroom, capped below
    # physical VMEM (v7x has 64 MiB per TC).
    vmem_bytes = (
        2 * tm * H * 2                  # x: double-buffered bf16
        + H * H * 2                     # w1: resident, single-buffered bf16
        + 8 * H * 4                     # packed b1/gamma/beta, f32
        + w2_buffers * H * tn * 2       # w2 column stream, bf16
        + w2_buffers * 8 * tn * 4       # b2 column stream (sublane-padded), f32
        + 2 * tm * tn * out_itemsize    # output stream
        + tm * H * 2                    # h_scratch, bf16
    )
    try:
        phys_vmem = pltpu.get_tpu_info().vmem_capacity_bytes
    except Exception:
        phys_vmem = 64 << 20            # v7x-safe fallback
    vmem_limit = min(max(int(vmem_bytes * 1.25) + (4 << 20), 32 << 20),
                     max(phys_vmem - (8 << 20), 32 << 20))

    kernel = functools.partial(_head_kernel, eps=eps,
                               prologue_chunk=prologue_chunk)

    out = pl.pallas_call(
        kernel,
        out_shape=jax.ShapeDtypeStruct((r_pad, v_pad), out_dtype),
        grid_spec=pltpu.PrefetchScalarGridSpec(
            num_scalar_prefetch=0,
            grid=grid,
            in_specs=[
                # x: streamed per row tile (default double-buffering).
                _spec((tm, H), lambda i, j: (i, 0)),
                # w1: resident, single-buffered (constant index map).
                _spec((H, H), lambda i, j: (0, 0), buffers=1),
                # packed b1/gamma/beta: resident, single-buffered.
                _spec((8, H), lambda i, j: (0, 0), buffers=1),
                # w2 / b2: streamed per column tile (sweep 2 vs 3 buffers).
                _spec((H, tn), lambda i, j: (0, j), buffers=w2_buffers),
                _spec((1, tn), lambda i, j: (0, j), buffers=w2_buffers),
            ],
            out_specs=pl.BlockSpec((tm, tn), lambda i, j: (i, j)),
            scratch_shapes=[pltpu.VMEM((tm, H), jnp.bfloat16)],
        ),
        compiler_params=pltpu.CompilerParams(
            dimension_semantics=("parallel", "arbitrary"),
            vmem_limit_bytes=vmem_limit),
    )(x_bf, prepared["w1"], prepared["lnv"], prepared["w2"], prepared["b2"])

    return out[:R, :V].reshape(*orig_lead, V)


# ----------------------------------------------------------------------------- #
# Pure-JAX reference (f32) for correctness checking
# ----------------------------------------------------------------------------- #
def head_reference(x, params, eps):
    h = x @ params["w1"] + params["b1"]
    h = 0.5 * h * (1.0 + lax.erf(h * 0.7071067811865476))
    mean = jnp.mean(h, axis=-1, keepdims=True)
    var = jnp.mean(jnp.square(h - mean), axis=-1, keepdims=True)
    h = (h - mean) * lax.rsqrt(var + eps) * params["gamma"] + params["beta"]
    return h @ params["w2"] + params["b2"]


# ----------------------------------------------------------------------------- #
# Parameter construction (mirrors the PyTorch __init__ shapes)
# ----------------------------------------------------------------------------- #
def init_params(key, config):
    H = config["hidden_size"]
    V = config["visual_vocab_size"]
    std = config["initializer_range"]
    ks = jax.random.split(key, 4)
    n = lambda k, shape: (std * jax.random.normal(k, shape)).astype(jnp.float32)
    return {
        # torch Linear stores (out, in); we store (in, out) so y = x @ W.
        "w1": n(ks[0], (H, H)),
        "b1": n(ks[1], (H,)),
        "gamma": jnp.ones((H,), jnp.float32),
        "beta": jnp.zeros((H,), jnp.float32),
        "w2": n(ks[2], (H, V)),
        "b2": n(ks[3], (V,)),
    }


# ----------------------------------------------------------------------------- #
# Main
# ----------------------------------------------------------------------------- #
if __name__ == "__main__":
    config = {
        "hidden_size": 128,          # lane-dense hidden dim
        "visual_vocab_size": 384,    # -> 3 column tiles of 128, zero padding
        "layer_norm_eps": 1e-12,
        "initializer_range": 0.02,
    }
    B, S = 2, 12                     # 24 rows -> 3 row tiles of 8, zero padding

    root = jax.random.PRNGKey(0)
    pkey, xkey = jax.random.split(root)
    params = init_params(pkey, config)
    hidden_states = jax.random.normal(
        xkey, (B, S, config["hidden_size"]), dtype=jnp.float32)

    # Pre-cast / pre-pad weights ONCE (not in the per-call hot path).
    prepared = prepare_head_params(params, block_cols=256)

    out = masked_img_token_prediction_head(
        hidden_states, prepared, eps=config["layer_norm_eps"],
        block_rows=16)               # small row tiles to exercise both grid axes
    out = jax.block_until_ready(out)

    assert out.shape == (B, S, config["visual_vocab_size"])
    assert bool(jnp.all(jnp.isfinite(out)))

    ref = head_reference(hidden_states, params, config["layer_norm_eps"])
    ref = jax.block_until_ready(ref)
    # bf16 MXU inputs / bf16 cached activations with f32 accumulation ->
    # loose tolerance vs the pure f32 reference.
    err = jnp.max(jnp.abs(out - ref))
    assert err < 5e-2, f"max abs err {err}"

    print("KERNEL_OK")
</pallas_src>

<mosaic_0001>
module attributes {stable_mosaic.version = 11 : i64} {
  func.func @_head_kernel(%arg0: i32, %arg1: i32, %arg2: memref<8x128xbf16, #tpu.memory_space<vmem>>, %arg3: memref<128x128xbf16, #tpu.memory_space<vmem>>, %arg4: memref<8x128xf32, #tpu.memory_space<vmem>>, %arg5: memref<128x128xbf16, #tpu.memory_space<vmem>>, %arg6: memref<1x128xf32, #tpu.memory_space<vmem>>, %arg7: memref<8x128xf32, #tpu.memory_space<vmem>>, %arg8: memref<8x128xbf16, #tpu.memory_space<vmem>>) attributes {dimension_semantics = [#tpu.dimension_semantics<parallel>, #tpu.dimension_semantics<arbitrary>], iteration_bounds = array<i64: 3, 3>, scalar_prefetch = 0 : i64, scratch_operands = 1 : i64, tpu.core_type = #tpu.core_type<tc>, window_params = [{transform_indices = @transform_0, window_bounds = array<i64: 8, 128>}, {pipeline_mode = #tpu.pipeline_mode<synchronous>, transform_indices = @transform_1, window_bounds = array<i64: 128, 128>}, {pipeline_mode = #tpu.pipeline_mode<synchronous>, transform_indices = @transform_2, window_bounds = array<i64: 8, 128>}, {pipeline_mode = #tpu.pipeline_mode<double_buffered>, transform_indices = @transform_3, window_bounds = array<i64: 128, 128>}, {pipeline_mode = #tpu.pipeline_mode<double_buffered>, transform_indices = @transform_4, window_bounds = array<i64: 1, 128>}, {transform_indices = @transform_5, window_bounds = array<i64: 8, 128>}]} {
    %c0_i32 = arith.constant 0 : i32
    %0 = arith.cmpi eq, %arg1, %c0_i32 : i32
    %1 = arith.extui %0 : i1 to i32
    %c0_i32_0 = arith.constant 0 : i32
    %2 = arith.cmpi ne, %1, %c0_i32_0 : i32
    scf.if %2 {
      %c0_8 = arith.constant 0 : index
      %c0_9 = arith.constant 0 : index
      %10 = vector.load %arg4[%c0_8, %c0_9] : memref<8x128xf32, #tpu.memory_space<vmem>>, vector<1x128xf32>
      %c1 = arith.constant 1 : index
      %c0_10 = arith.constant 0 : index
      %11 = vector.load %arg4[%c1, %c0_10] : memref<8x128xf32, #tpu.memory_space<vmem>>, vector<1x128xf32>
      %c2 = arith.constant 2 : index
      %c0_11 = arith.constant 0 : index
      %12 = vector.load %arg4[%c2, %c0_11] : memref<8x128xf32, #tpu.memory_space<vmem>>, vector<1x128xf32>
      %c0_12 = arith.constant 0 : index
      %c0_13 = arith.constant 0 : index
      %13 = vector.load %arg2[%c0_12, %c0_13] : memref<8x128xbf16, #tpu.memory_space<vmem>>, vector<8x128xbf16>
      %c0_14 = arith.constant 0 : index
      %c0_15 = arith.constant 0 : index
      %14 = vector.load %arg3[%c0_14, %c0_15] : memref<128x128xbf16, #tpu.memory_space<vmem>>, vector<128x128xbf16>
      %cst_16 = arith.constant dense<0.000000e+00> : vector<8x128xf32>
      %15 = tpu.matmul %13, %14, %cst_16 {dimension_numbers = #tpu.dot_dimension_numbers<[1], [0], [0], [1], [0, 0, 1, 1], [], []>} : vector<8x128xbf16>, vector<128x128xbf16>, vector<8x128xf32> -> vector<8x128xf32>
      %16 = vector.broadcast %10 : vector<1x128xf32> to vector<8x128xf32>
      %17 = arith.addf %15, %16 : vector<8x128xf32>
      %cst_17 = arith.constant 5.000000e-01 : f32
      %18 = vector.broadcast %cst_17 : f32 to vector<8x128xf32>
      %19 = arith.mulf %18, %17 : vector<8x128xf32>
      %cst_18 = arith.constant 0.707106769 : f32
      %20 = vector.broadcast %cst_18 : f32 to vector<8x128xf32>
      %21 = arith.mulf %17, %20 : vector<8x128xf32>
      %22 = math.erf %21 : vector<8x128xf32>
      %cst_19 = arith.constant 1.000000e+00 : f32
      %23 = vector.broadcast %cst_19 : f32 to vector<8x128xf32>
      %24 = arith.addf %23, %22 : vector<8x128xf32>
      %25 = arith.mulf %19, %24 : vector<8x128xf32>
      %cst_20 = arith.constant dense<0.000000e+00> : vector<8xf32>
      %26 = vector.multi_reduction <add>, %25, %cst_20 [1] : vector<8x128xf32> to vector<8xf32>
      %27 = vector.shape_cast %26 : vector<8xf32> to vector<8x1xf32>
      %cst_21 = arith.constant 1.280000e+02 : f32
      %28 = vector.broadcast %cst_21 : f32 to vector<8x1xf32>
      %29 = arith.divf %27, %28 : vector<8x1xf32>
      %30 = vector.broadcast %29 : vector<8x1xf32> to vector<8x128xf32>
      %31 = arith.subf %25, %30 : vector<8x128xf32>
      %32 = arith.mulf %31, %31 : vector<8x128xf32>
      %cst_22 = arith.constant dense<0.000000e+00> : vector<8xf32>
      %33 = vector.multi_reduction <add>, %32, %cst_22 [1] : vector<8x128xf32> to vector<8xf32>
      %34 = vector.shape_cast %33 : vector<8xf32> to vector<8x1xf32>
      %cst_23 = arith.constant 1.280000e+02 : f32
      %35 = vector.broadcast %cst_23 : f32 to vector<8x1xf32>
      %36 = arith.divf %34, %35 : vector<8x1xf32>
      %cst_24 = arith.constant 0.000000e+00 : f32
      %37 = vector.broadcast %cst_24 : f32 to vector<8x1xf32>
      %38 = arith.maximumf %36, %37 : vector<8x1xf32>
      %cst_25 = arith.constant 9.99999996E-13 : f32
      %39 = vector.broadcast %cst_25 : f32 to vector<8x1xf32>
      %40 = arith.addf %38, %39 : vector<8x1xf32>
      %41 = math.rsqrt %40 : vector<8x1xf32>
      %42 = vector.broadcast %41 : vector<8x1xf32> to vector<8x128xf32>
      %43 = arith.mulf %31, %42 : vector<8x128xf32>
      %44 = vector.broadcast %11 : vector<1x128xf32> to vector<8x128xf32>
      %45 = arith.mulf %43, %44 : vector<8x128xf32>
      %46 = vector.broadcast %12 : vector<1x128xf32> to vector<8x128xf32>
      %47 = arith.addf %45, %46 : vector<8x128xf32>
      %48 = arith.truncf %47 : vector<8x128xf32> to vector<8x128xbf16>
      %c0_26 = arith.constant 0 : index
      %c0_27 = arith.constant 0 : index
      %49 = vector.load %arg8[%c0_26, %c0_27] : memref<8x128xbf16, #tpu.memory_space<vmem>>, vector<8x128xbf16>
      tpu.vector_store %arg8[%c0_26, %c0_27], %48 {strides = array<i32>} : memref<8x128xbf16, #tpu.memory_space<vmem>>, vector<8x128xbf16>,
    } else {
    }
    %c0 = arith.constant 0 : index
    %c0_1 = arith.constant 0 : index
    %3 = vector.load %arg8[%c0, %c0_1] : memref<8x128xbf16, #tpu.memory_space<vmem>>, vector<8x128xbf16>
    %c0_2 = arith.constant 0 : index
    %c0_3 = arith.constant 0 : index
    %4 = vector.load %arg5[%c0_2, %c0_3] : memref<128x128xbf16, #tpu.memory_space<vmem>>, vector<128x128xbf16>
    %cst = arith.constant dense<0.000000e+00> : vector<8x128xf32>
    %5 = tpu.matmul %3, %4, %cst {dimension_numbers = #tpu.dot_dimension_numbers<[1], [0], [0], [1], [0, 0, 1, 1], [], []>} : vector<8x128xbf16>, vector<128x128xbf16>, vector<8x128xf32> -> vector<8x128xf32>
    %c0_4 = arith.constant 0 : index
    %c0_5 = arith.constant 0 : index
    %6 = vector.load %arg6[%c0_4, %c0_5] : memref<1x128xf32, #tpu.memory_space<vmem>>, vector<1x128xf32>
    %7 = vector.broadcast %6 : vector<1x128xf32> to vector<8x128xf32>
    %8 = arith.addf %5, %7 : vector<8x128xf32>
    %c0_6 = arith.constant 0 : index
    %c0_7 = arith.constant 0 : index
    %9 = vector.load %arg7[%c0_6, %c0_7] : memref<8x128xf32, #tpu.memory_space<vmem>>, vector<8x128xf32>
    tpu.vector_store %arg7[%c0_6, %c0_7], %8 {strides = array<i32>} : memref<8x128xf32, #tpu.memory_space<vmem>>, vector<8x128xf32>,
    return
  }
  func.func @transform_0(%arg0: i32, %arg1: i32) -> (i32, i32) {
    %c0_i32 = arith.constant 0 : i32
    %c0_i32_0 = arith.constant 0 : i32
    return %arg0, %c0_i32 : i32, i32
  }
  func.func @transform_1(%arg0: i32, %arg1: i32) -> (i32, i32) {
    %c0_i32 = arith.constant 0 : i32
    %c0_i32_0 = arith.constant 0 : i32
    %c0_i32_1 = arith.constant 0 : i32
    return %c0_i32, %c0_i32_0 : i32, i32
  }
  func.func @transform_2(%arg0: i32, %arg1: i32) -> (i32, i32) {
    %c0_i32 = arith.constant 0 : i32
    %c0_i32_0 = arith.constant 0 : i32
    %c0_i32_1 = arith.constant 0 : i32
    return %c0_i32, %c0_i32_0 : i32, i32
  }
  func.func @transform_3(%arg0: i32, %arg1: i32) -> (i32, i32) {
    %c0_i32 = arith.constant 0 : i32
    %c0_i32_0 = arith.constant 0 : i32
    return %c0_i32, %arg1 : i32, i32
  }
  func.func @transform_4(%arg0: i32, %arg1: i32) -> (i32, i32) {
    %c0_i32 = arith.constant 0 : i32
    %c0_i32_0 = arith.constant 0 : i32
    return %c0_i32, %arg1 : i32, i32
  }
  func.func @transform_5(%arg0: i32, %arg1: i32) -> (i32, i32) {
    %c0_i32 = arith.constant 0 : i32
    return %arg0, %arg1 : i32, i32
  }
}

</mosaic_0001>

<bundles_post_ra>
// kernel: tpu_custom_call.1
= control target key start
LH: loop header
LB: loop body
LE: loop exit
PB: predicated region body
PF: predicated region fallthrough
CT: control target
= control target key end

     0   :  { %s1674_s0 = inlined_call_operand.hbm [shape: bf16[24,128], index: 0, kind: input, shape index: {}]   ;;  %s1675_s1 = inlined_call_operand.hbm [shape: bf16[128,128], index: 1, kind: input, shape index: {}]   ;;  %s1676_s2 = inlined_call_operand.hbm [shape: f32[8,128], index: 2, kind: input, shape index: {}]   ;;  %s1677_s3 = inlined_call_operand.hbm [shape: bf16[128,384], index: 3, kind: input, shape index: {}]   ;;  %s1678_s4 = inlined_call_operand.vmem [shape: f32[1,384], index: 4, kind: input, shape index: {}]   ;;  %s1679_s5 = inlined_call_operand.hbm [shape: f32[24,384], index: 5, kind: output, shape index: {}]  }
   0x1   :  { %1696 = sst [smem:[#allocation27_spill]] %s1674_s0 }
   0x2   :  { %1697 = sst [smem:[#allocation28_spill]] %s1675_s1 }
   0x3   :  { %1698 = sst [smem:[#allocation29_spill]] %s1676_s2 }
   0x4   :  { %1699 = sst [smem:[#allocation30_spill]] %s1679_s5 }
   0x5   :  { %10 = vsyncpa [#allocation4], 0 }
   0x6   :  { %12 = vsyncpa [#allocation4 + $0x1], 0 }
   0x7   :  { %13 = vsyncpa [#allocation7], 0 }
   0x8   :  { %14 = vsyncpa [#allocation10], 0 }
   0x9   :  { %16 = vsyncpa [#allocation10 + $0x1], 0 }
   0xa   :  { %17 = vsyncpa [#allocation5], 0 }
   0xb   :  { %19 = vsyncpa [#allocation5 + $0x1], 0  ;;  %s1327_s18 = smov 0   ;;  %s1329_s19 = smov 0  }
   0xc   :  { %s1331_s20 = smov 0   ;;  %s1333_s21 = smov 0  }
   0xd   :  { %s1335_s22 = smov 0   ;;  %s1337_s23 = smov 0  }
   0xe   :  { %s1339_s24 = smov 0   ;;  %s1341_s25 = smov 0  }
   0xf   :  { %s1343_s26 = smov 0   ;;  %s1345_s27 = smov 0  }
  0x10   :  { %s1347_s28 = smov 0   ;;  %s1349_s29 = smov 0  }
  0x11   :  { %s1351_s30 = smov 0   ;;  %s1353_s6 = smov 0  }
  0x12 LB: > { %1700 = sst [smem:[#allocation16_spill]] %s1231_s18  ;;  %s744_s7 = sadd.s32 4294967295, %s1283_s6   ;;  %s1283_s6 = sphi %s1353_s6, %s25_s6   ;;  %s1279_s30 = sphi %s1351_s30, %s1744_s30   ;;  %s1275_s29 = sphi %s1349_s29, %s1753_s29   ;;  %s1271_s28 = sphi %s1347_s28, %s1742_s28   ;;  %s1267_s27 = sphi %s1345_s27, %s1752_s27   ;;  %s1263_s26 = sphi %s1343_s26, %s1741_s26   ;;  %s1259_s25 = sphi %s1341_s25, %s1751_s25   ;;  %s1255_s24 = sphi %s1339_s24, %s1750_s24   ;;  %s1251_s23 = sphi %s1337_s23, %s1739_s23   ;;  %s1247_s22 = sphi %s1335_s22, %s1749_s22   ;;  %s1243_s21 = sphi %s1333_s21, %s1748_s21   ;;  %s1239_s20 = sphi %s1331_s20, %s1747_s20   ;;  %s1235_s19 = sphi %s1329_s19, %s1746_s19   ;;  %s1231_s18 = sphi %s1327_s18, %s1745_s18  }
  0x13   : > { %1701 = sst [smem:[#allocation17_spill]] %s1251_s23  ;;  %s745_s8 = sadd.s32 4294967294, %s1283_s6  }
  0x14   : > { %1702 = sst [smem:[#allocation18_spill]] %s1263_s26  ;;  %p1397_p0 = scmp.eq.s32.totalorder %s744_s7, 0 }
  0x15   : > { %1703 = sst [smem:[#allocation19_spill]] %s1271_s28  ;;  %p125_p1 = scmp.ne.s32.totalorder %s1247_s22, %s1243_s21 }
  0x16   : > { %1704 = sst [smem:[#allocation20_spill]] %s1279_s30  ;;  %p176_p2 = scmp.ne.s32.totalorder %s1239_s20, %s1235_s19 }
  0x17   : > { %s1705_s9 = scalar_select %p1397_p0, 1, 0 }
  0x18   : > { %p177_p3 = scmp.eq.s32.totalorder %s744_s7, 8  ;;  %p1406_p4 = por %p125_p1, %p1397_p0 }
  0x19   : > { %p182_p5 = scmp.ne.s32.totalorder %s1235_s19, %s1231_s18  ;;  %p183_p7 = scmp.eq.s32.totalorder %s745_s8, 8 }
  0x1a   : > { %s1706_s10 = scalar_select %p1406_p4, 1, 0 }
  0x1b   : > { %p1412_p6 = por %p177_p3, %p176_p2  ;;  %p746_p8 = scmp.ge.s32.totalorder %s1283_s6, 1 }
  0x1c   : > { %p190_p9 = scmp.lt.s32.totalorder %s1283_s6, 10  ;;  %p1418_p10 = por %p183_p7, %p182_p5 }
  0x1d   : > { %s1707_s11 = scalar_select %p1412_p6, 1, 0 }
  0x1e   : > { %s1709_s12 = scalar_select %p1418_p10, 1, 0 }
  0x1f   : > { %1708 = sst [smem:[#allocation21_spill]] %s1707_s11  ;;  %p1422_p11 = pnand %p746_p8, %p190_p9 }
  0x20   : > { %1710 = sst [smem:[#allocation22_spill]] %s1709_s12  ;;  %s1285_s14 = smov [#allocation6]  }
  0x21   : > { %s202_s15 = sshll.u32 %s1285_s14, 4  ;;  %p858_p12 = pneg %p1422_p11  ;;  %s203_s15 = int_to_ptr.vmem [resolvable:$true] %s202_s15 }
  0x22   : > { %s1286_s17 = smov [#allocation8]   ;;  %s1034_s7 = scalar_lea.vmem %s203_s15, 1024 }
  0x23   : > { %p1430_p13 = pnand %p858_p12, %p1397_p0  ;;  %s216_s21 = sshll.u32 %s1286_s17, 4  ;;  %s217_s21 = int_to_ptr.vmem [resolvable:$true] %s216_s21 }
  0x24   : > { %p1035_p2 = scmp.ne.s32.totalorder %s203_s15, %s1034_s7  ;;  %p1042_p7 = scmp.lt.s32.totalorder %s203_s15, %s203_s15 }
  0x25   : > { %p1025_p1 = pneg %p1430_p13  ;;  %p1043_p8 = scmp.lt.s32.totalorder %s1034_s7, %s1034_s7 }
  0x27   : > { %p1037_p3 = pnand %p1035_p2, %p1025_p1  ;;  %p1044_p9 = por %p1043_p8, %p1042_p7 }
  0x29   : > { %p1038_p5 = pneg %p1037_p3 }
  0x2b   : > { %p1045_p12 = pnand %p1044_p9, %p1038_p5 }
  0x2d   : > { %1048 = shalt.err (!%p1045_p12)
}
  0x2e   : > { %s1683_s8 = smov 64   ;;  %s1684_s14 = smov 4  }
  0x2f   : > { %s1713_s1 = sld [smem:[#allocation28_spill]]  ;;  %s1060_s18 = scalar_lea.vmem %s217_s21, 128 }
  0x30   : > { %p1061_p2 = scmp.ne.s32.totalorder %s217_s21, %s1060_s18  ;;  %p1068_p5 = scmp.lt.s32.totalorder %s217_s21, %s217_s21 }
  0x31   : > { %p1069_p8 = scmp.lt.s32.totalorder %s1060_s18, %s1060_s18 }
  0x32   : > { %p1063_p3 = pnand %p1061_p2, %p1025_p1 }
  0x33   : > { %p1070_p9 = por %p1069_p8, %p1068_p5 }
  0x34   : > { %p1064_p7 = pneg %p1063_p3 }
  0x35   : > { %861 = dma.hbm_to_vmem [thread:$0]  (!%p1430_p13), %s1713_s1, 1024, %s203_s15, [#allocation7], %s1683_s8, %s1683_s8, %s1684_s14  }
  0x36   : > { %p1071_p12 = pnand %p1070_p9, %p1064_p7 }
  0x38   : > { %1074 = shalt.err (!%p1071_p12)
}
  0x39   : > { %s1714_s2 = sld [smem:[#allocation29_spill]]  ;;  %s34_s18 = sadd.s32 1, %s1275_s29 }
  0x3a   : > { %p35_p1 = scmp.ge.s32.totalorder %s34_s18, 3  ;;  %s37_s5 = sadd.s32 1, %s1279_s30 }
  0x3b   : > { %s44_s12 = sadd.s32 1, %s1263_s26  ;;  %p51_p2 = scmp.ne.s32.totalorder %s1263_s26, %s1259_s25 }
  0x3c   : > { %s1755_s18 = smov (%p35_p1, %s34_s18), 0  ;;  %s1757_s5 = smov (!%p35_p1, %s37_s5), %s1279_s30 }
  0x3d   : > { %1715 = sst [smem:[#allocation23_spill]] %s1755_s18  ;;  %p52_p3 = scmp.eq.s32.totalorder %s1283_s6, 0 }
  0x3e   : > { %p57_p7 = scmp.ne.s32.totalorder %s1259_s25, %s1255_s24  ;;  %s109_s15 = ssub.s32 %s1275_s29, %s1755_s18 }
  0x3f   : > { %864 = dma.hbm_to_vmem [thread:$0]  (!%p1430_p13), %s1714_s2, 128, %s217_s21, [#allocation7]  }
  0x40   : > { %p39_p13 = scmp.ge.s32.totalorder %s1757_s5, 3  ;;  %p1470_p5 = por %p52_p3, %p51_p2 }
  0x41   : > { %p1476_p8 = por %p1397_p0, %p57_p7  ;;  %p110_p9 = scmp.eq.s32.totalorder %s109_s15, 0 }
  0x42   : > { %s1759_s5 = smov (%p39_p13, %s1757_s5), 0  ;;  %s112_s24 = sadd.s32 1, %s1251_s23 }
  0x43   : > { %1718 = sst [smem:[#allocation24_spill]] %s1759_s5  ;;  %s41_s17 = ssub.s32 %s1279_s30, %s1759_s5 }
  0x44   : > { %p119_p12 = scmp.ne.s32.totalorder %s1251_s23, %s1247_s22  ;;  %p42_p1 = scmp.eq.s32.totalorder %s41_s17, 0 }
  0x45   : > { %s163_s7 = sor.u32 %s109_s15, %s41_s17  ;;  %s166_s2 = sadd.s32 1, %s1239_s20 }
  0x46   : > { %s1488_s8 = scalar_select %p110_p9, %s1251_s23, %s112_s24  }
  0x47   : > { %s1491_s14 = scalar_select %p42_p1, %s1263_s26, %s44_s12  }
  0x48   : > { %1719 = sst [smem:[#allocation25_spill]] %s1488_s8  ;;  %p1495_p2 = por %p119_p12, %p52_p3 }
  0x49   : > { %1720 = sst [smem:[#allocation26_spill]] %s1491_s14  ;;  %p164_p7 = scmp.eq.s32.totalorder %s163_s7, 0 }
  0x4a   : > { %p878_p13 = scmp.lt.s32.totalorder %s1283_s6, 9  ;;  %s227_s5 = sand.u32 1, %s1263_s26  }
  0x4b   : > { %s1502_s18 = scalar_select %p164_p7, %s1239_s20, %s166_s2  }
  0x4c   : > { %s751_s11 = sshll.u32 %s1279_s30, 6  ;;  %s750_s28 = sshll.u32 %s227_s5, 2 }
  0x4d   : > { %s1722_s0 = sld [smem:[#allocation27_spill]]  ;;  %s231_s12 = scalar_lea.vmem [#allocation3], %s750_s28 }
  0x4e   : > { %s238_s14 = sshll.u32 %s231_s12, 4  ;;  %p1511_p3 = pnand %p878_p13, %p1470_p5  ;;  %s239_s14 = int_to_ptr.vmem [resolvable:$true] %s238_s14 }
  0x4f   : > { %p1517_p9 = pnand %p878_p13, %p1495_p2  ;;  %s245_s7 = sand.u32 1, %s1251_s23  }
  0x50   : > { %s228_s30 = scalar_lea.sflag [#allocation4], %s227_s5  ;;  %p1077_p12 = pneg %p1511_p3 }
  0x51   : > { %s1088_s15 = scalar_lea.vmem %s239_s14, 64  ;;  %s1289_s28 = smov [#allocation3]  }
  0x52   : > { %p1089_p1 = scmp.ne.s32.totalorder %s239_s14, %s1088_s15 }
  0x53   : > { %s236_s17 = scalar_lea.hbm %s1722_s0, %s751_s11  ;;  %s1093_s11 = sshll.u32 %s1289_s28, 4  ;;  %s1094_s11 = int_to_ptr.vmem [resolvable:$false] %s1093_s11 }
  0x54   : > { %p1091_p7 = pnand %p1089_p1, %p1077_p12  ;;  %s1095_s16 = scalar_lea.vmem %s1094_s11, 128 }
  0x55   : > { %p1096_p5 = scmp.lt.s32.totalorder %s239_s14, %s1094_s11  ;;  %p1097_p6 = scmp.lt.s32.totalorder %s1095_s16, %s1088_s15 }
  0x56   : > { %p1092_p10 = pneg %p1091_p7 }
  0x57   : > { %p1098_p4 = por %p1097_p6, %p1096_p5 }
  0x59   : > { %p1099_p0 = pnand %p1098_p4, %p1092_p10 }
  0x5b   : > { %1102 = shalt.err (!%p1099_p0)
}
  0x5c   : > { %868 = dma.hbm_to_vmem [thread:$0]  (!%p1511_p3), %s236_s17, 64, %s239_s14, %s228_s30  }
  0x5d   : > { %s752_s1 = sshll.u32 %s245_s7, 6  ;;  %s753_s5 = sshll.u32 %s1275_s29, 6 }
  0x5e   : > { %s254_s0 = scalar_lea.hbm %s1677_s3, %s753_s5  ;;  %s249_s26 = scalar_lea.vmem [#allocation9], %s752_s1 }
  0x5f   : > { %s255_s28 = sshll.u32 %s249_s26, 4  ;;  %s246_s23 = scalar_lea.sflag [#allocation10], %s245_s7  ;;  %s256_s28 = int_to_ptr.vmem [resolvable:$true] %s255_s28 }
  0x60   : > { %p1105_p2 = pneg %p1517_p9  ;;  %s1116_s15 = scalar_lea.vmem %s256_s28, 1024 }
  0x61   : > { %p1117_p4 = scmp.ne.s32.totalorder %s256_s28, %s1116_s15  ;;  %s1290_s8 = smov [#allocation9]  }
  0x62   : > { %s1121_s11 = sshll.u32 %s1290_s8, 4  ;;  %s1122_s11 = int_to_ptr.vmem [resolvable:$false] %s1121_s11 }
  0x63   : > { %p1119_p0 = pnand %p1117_p4, %p1105_p2  ;;  %s1123_s30 = scalar_lea.vmem %s1122_s11, 2048 }
  0x64   : > { %p1124_p10 = scmp.lt.s32.totalorder %s256_s28, %s1122_s11  ;;  %p1125_p13 = scmp.lt.s32.totalorder %s1123_s30, %s1116_s15 }
  0x65   : > { %p1120_p6 = pneg %p1119_p0 }
  0x66   : > { %p1126_p3 = por %p1125_p13, %p1124_p10 }
  0x68   : > { %p1127_p12 = pnand %p1126_p3, %p1120_p6 }
  0x6a   : > { %1130 = shalt.err (!%p1127_p12)
}
  0x6b   : > { %s1291_s14 = smov 192   ;;  %s1725_s26 = smov 4  }
  0x6c   : > { %s1726_s17 = smov 64   ;;  %273 = sbr.rel (%p1422_p11) target bundleno = 930 (0x3a2), region = 40 }
  0x6d   : > { %871 = dma.hbm_to_vmem [thread:$0]  (!%p1517_p9), %s254_s0, 1024, %s256_s28, %s246_s23, %s1291_s14, %s1726_s17, %s1725_s26  }
  0x6e   : > { %s275_s7 = sand.u32 (!%p1422_p11), 1, %s1259_s25  }
  0x6f   : > { %s1539_s16 = sshll.u32 (!%p1422_p11), %s275_s7, 2  ;;  %s276_s1 = scalar_lea.sflag (!%p1422_p11), [#allocation4], %s275_s7 }
  0x70   : > { %s279_s5 = scalar_lea.vmem (!%p1422_p11), [#allocation3], %s1539_s16 }
  0x71   : > { %1214 = dma.done.wait (%p1476_p8), %s276_s1, 64  }
  0x72   : > { %1216 = vsyncadd (%p1476_p8), %s276_s1, 4294967232  ;;  %p1727_p1 = scmp.ne.s32.totalorder %s1705_s9, 0 }
  0x74   : > { %1218 = dma.done.wait (%p1727_p1), [#allocation7], 1152  }
  0x75   : > { %1220 = vsyncadd (%p1727_p1), [#allocation7], 4294966144  ;;  %s292_s0 = sand.u32 1, %s1247_s22   ;;  %p1728_p11 = scmp.ne.s32.totalorder %s1706_s10, 0 }
  0x76   : > { %s758_s23 = sshll.u32 %s292_s0, 6  ;;  %s293_s13 = scalar_lea.sflag [#allocation10], %s292_s0 }
  0x77   : > { %s1551_s2 = scalar_lea.vmem [#allocation9], %s758_s23 }
  0x78   : > { %1222 = dma.done.wait (%p1728_p11), %s293_s13, 1024  }
  0x79   : > { %1224 = vsyncadd (%p1728_p11), %s293_s13, 4294966272  ;;  %s328_s21 = sand.u32 1, %s1235_s19   ;;  %p331_p8 = scmp.lt.s32.totalorder %s1267_s27, 2 }
  0x7a   : > { %s1561_s9 = sshll.u32 %s328_s21, 3  ;;  %p760_p9 = scmp.ne.s32.totalorder %s1267_s27, 0 }
  0x7b   : > { %s1564_s24 = scalar_select %p331_p8, %s1267_s27, 2 }
  0x7c   : > { %s330_s8 = scalar_lea.vmem [#allocation11], %s1561_s9  ;;  %338 = sbr.rel (%p760_p9) target bundleno = 688 (0x2b0), region = 60 }
  0x7d   : > { %s333_s15 = scalar_lea.vmem %s1678_s4, %s1564_s24 }
  0x81   : > { %v1003_v0 = vld [vmem:[#allocation6 + $0x38] sm:$0xff]   ;;  %v1292_v1 = vmov 0.0   ;;  %v1004_v2 = vld [vmem:[#allocation6 + $0x30] sm:$0xff]   ;;  %vm1293_vm0 = vmmov 0   ;;  %v1005_v3 = vld [vmem:[#allocation6 + $0x28] sm:$0xff]  }
  0x82   : > { %803 = vmatprep.subr.bf16.mxu0 %v1292_v1  ;;  %819 = vmatprep.mubr.msk.bf16.mxu0 %vm1293_vm0, %v1292_v1  ;;  %v1006_v4 = vld [vmem:[#allocation6 + $0x20] sm:$0xff]   ;;  %v1007_v5 = vld [vmem:[#allocation6 + $0x18] sm:$0xff]   ;;  %v1008_v6 = vld [vmem:[#allocation6 + $0x10] sm:$0xff]  }
  0x83   : > { %804 = vmatpush3.bf16.msra.mxu0 %v1003_v0  ;;  %v1009_v7 = vld [vmem:[#allocation6 + $0x8] sm:$0xff]   ;;  %v1010_v8 = vld [vmem:[#allocation6] sm:$0xff]   ;;  %v342_v9 = vld [vmem:[%s279_s5] sm:$0xf] }
  0x84   : > { %805 = vmatprep.subr.bf16.mxu0 %v1292_v1  ;;  %v761_v10 = vld [vmem:[#allocation8] ss:$0 sm:$0xff]  ;;  %v770_v30 = vld [vmem:[#allocation8 + $0x1] ss:$0 sm:$0xff]  ;;  %v771_v32 = vld [vmem:[#allocation8 + $0x2] ss:$0 sm:$0xff] }
  0x87   : > { %806 = vmatpush3.bf16.msra.mxu0 %v1004_v2 }
  0x88   : > { %807 = vmatprep.subr.bf16.mxu0 %v1292_v1 }
  0x8b   : > { %808 = vmatpush3.bf16.msra.mxu0 %v1005_v3 }
  0x8c   : > { %809 = vmatprep.subr.bf16.mxu0 %v1292_v1 }
  0x8f   : > { %810 = vmatpush3.bf16.msra.mxu0 %v1006_v4 }
  0x90   : > { %811 = vmatprep.subr.bf16.mxu0 %v1292_v1 }
  0x93   : > { %812 = vmatpush3.bf16.msra.mxu0 %v1007_v5 }
  0x94   : > { %813 = vmatprep.subr.bf16.mxu0 %v1292_v1 }
  0x97   : > { %814 = vmatpush3.bf16.msra.mxu0 %v1008_v6 }
  0x98   : > { %815 = vmatprep.subr.bf16.mxu0 %v1292_v1 }
  0x9b   : > { %816 = vmatpush3.bf16.msra.mxu0 %v1009_v7 }
  0x9c   : > { %817 = vmatprep.subr.bf16.mxu0 %v1292_v1 }
  0x9f   : > { %818 = vmatpush3.bf16.msra.mxu0 %v1010_v8 }
  0xa2   : > { %820 = vmatmul.mubr.bf16.vlgmr.msra.gmra.mxu0 %v342_v9 }
 0x162   : > { %v445_v11 = vpop.f32.mrf.mxu0 }
 0x163   : > { %v446_v12 = vadd.f32 %v761_v10, %v445_v11 }
 0x164   : > { %v821_v13 = vpop.f32.mrf.mxu0 }
 0x165   : > { %v452_v14 = vmul.f32 0.70710677, %v446_v12  ;;  %v451_v18 = vmul.f32 0.5, %v446_v12 }
 0x166   : > { %v448_v15 = vpop.f32.mrf.mxu0 }
 0x167   : > { %1011 = verf.f32 %v452_v14 }
 0x168   : > { %v822_v16 = vpop.f32.mrf.mxu0 }
 0x174   : > { %v1012_v17 = vpop.eup %1011 }
 0x175   : > { %v454_v19 = vadd.f32 1.0, %v1012_v17 }
 0x177   : > { %v455_v20 = vmul.f32 %v454_v19, %v451_v18 }
 0x179   : > { %456 = vadd.xlane.f32.xlu0 %v455_v20 }
 0x202   : > { %v457_v21 = vpop.xlane.xlu0 %456 }
 0x203   : > { %v459_v22 = vmul.f32 0.0078125, %v457_v21 }
 0x205   : > { %v460_v23 = vsub.f32 %v455_v20, %v459_v22 }
 0x207   : > { %v461_v24 = vmul.f32 %v460_v23, %v460_v23 }
 0x209   : > { %462 = vadd.xlane.f32.xlu0 %v461_v24 }
 0x292   : > { %v463_v25 = vpop.xlane.xlu0 %462 }
 0x293   : > { %v464_v26 = vmul.f32 0.0078125, %v463_v25 }
 0x295   : > { %v465_v27 = vmax.f32 %v464_v26, 0.0 }
 0x297   : > { %v466_v28 = vadd.f32 1e-12, %v465_v27 }
 0x299   : > { %1013 = vrsqrt.f32 %v466_v28 }
 0x2a6   : > { %v1014_v29 = vpop.eup %1013 }
 0x2a7   : > { %v468_v31 = vmul.f32 %v1014_v29, %v460_v23 }
 0x2a9   : > { %v473_v33 = vmul.f32 %v770_v30, %v468_v31 }
 0x2ab   : > { %v478_v34 = vadd.f32 %v771_v32, %v473_v33 }
 0x2ad   : > { %v479_v35 = vpack.c.bf16 %v478_v34, %v478_v34 }
 0x2af   : > { %480 = vst [vmem:[#allocation2] sm:$0xf] %v479_v35 }
 0x2b0 PF: > { %v1015_v36 = vld [vmem:[%s1551_s2 + $0x38] sm:$0xff]   ;;  %v1294_v37 = vmov 0.0   ;;  %v1016_v38 = vld [vmem:[%s1551_s2 + $0x30] sm:$0xff]   ;;  %vm1295_vm1 = vmmov 0   ;;  %v1017_v39 = vld [vmem:[%s1551_s2 + $0x28] sm:$0xff]   ;;  %s1729_s10 = sld [smem:[#allocation19_spill]] }
 0x2b1   : > { %823 = vmatprep.subr.bf16.mxu0 %v1294_v37  ;;  %839 = vmatprep.mubr.msk.bf16.mxu0 %vm1295_vm1, %v1294_v37  ;;  %v1018_v40 = vld [vmem:[%s1551_s2 + $0x20] sm:$0xff]   ;;  %v1019_v41 = vld [vmem:[%s1551_s2 + $0x18] sm:$0xff]   ;;  %v1020_v42 = vld [vmem:[%s1551_s2 + $0x10] sm:$0xff]   ;;  %s1730_s11 = sld [smem:[#allocation21_spill]]  ;;  %s610_s16 = sshll.u32 %s330_s8, 4  ;;  %s1596_s16 = int_to_ptr.vmem [resolvable:$true] %s610_s16 }
 0x2b2   : > { %824 = vmatpush3.bf16.msra.mxu0 %v1015_v36  ;;  %v1021_v43 = vld [vmem:[%s1551_s2 + $0x8] sm:$0xff]   ;;  %v1022_v44 = vld [vmem:[%s1551_s2] sm:$0xff]   ;;  %s1731_s0 = sld [smem:[#allocation30_spill]]  ;;  %s1131_s13 = scalar_lea.vmem %s1596_s16, 128 }
 0x2b3   : > { %825 = vmatprep.subr.bf16.mxu0 %v1294_v37  ;;  %v772_v46 = vld [vmem:[%s333_s15] ss:$0 sm:$0xff]  ;;  %p1132_p7 = scmp.ne.s32.totalorder %s1596_s16, %s1131_s13  ;;  %s1296_s2 = smov [#allocation11]  }
 0x2b4   : > { %s1135_s24 = sshll.u32 %s1296_s2, 4  ;;  %s1136_s24 = int_to_ptr.vmem [resolvable:$false] %s1135_s24 }
 0x2b5   : > { %s1137_s12 = scalar_lea.vmem %s1136_s24, 256  ;;  %p1138_p0 = scmp.lt.s32.totalorder %s1596_s16, %s1136_s24 }
 0x2b6   : > { %826 = vmatpush3.bf16.msra.mxu0 %v1016_v38  ;;  %v481_v45 = vld [vmem:[#allocation2] sm:$0xf]  ;;  %s843_s30 = smul.u32 3, %s1729_s10  ;;  %p1139_p6 = scmp.lt.s32.totalorder %s1137_s12, %s1131_s13 }
 0x2b7   : > { %827 = vmatprep.subr.bf16.mxu0 %v1294_v37  ;;  %p1732_p5 = scmp.ne.s32.totalorder %s1730_s11, 0 }
 0x2b8   : > { %s606_s14 = sadd.s32 %s1267_s27, %s843_s30  ;;  %s595_s27 = scalar_lea.sflag [#allocation5], %s328_s21 }
 0x2b9   : > { %s782_s7 = sshll.u32 %s606_s14, 7  ;;  %p1133_p2 = pnand %p1132_p7, %p1732_p5 }
 0x2ba   : > { %828 = vmatpush3.bf16.msra.mxu0 %v1017_v39  ;;  %s1594_s23 = scalar_lea.hbm %s1731_s0, %s782_s7  ;;  %p1140_p10 = por %p1139_p6, %p1138_p0 }
 0x2bb   : > { %829 = vmatprep.subr.bf16.mxu0 %v1294_v37  ;;  %p1134_p4 = pneg %p1133_p2 }
 0x2bd   : > { %p1141_p13 = pnand %p1140_p10, %p1134_p4 }
 0x2be   : > { %830 = vmatpush3.bf16.msra.mxu0 %v1018_v40 }
 0x2bf   : > { %831 = vmatprep.subr.bf16.mxu0 %v1294_v37 }
 0x2c2   : > { %832 = vmatpush3.bf16.msra.mxu0 %v1019_v41 }
 0x2c3   : > { %833 = vmatprep.subr.bf16.mxu0 %v1294_v37 }
 0x2c6   : > { %834 = vmatpush3.bf16.msra.mxu0 %v1020_v42 }
 0x2c7   : > { %835 = vmatprep.subr.bf16.mxu0 %v1294_v37 }
 0x2ca   : > { %836 = vmatpush3.bf16.msra.mxu0 %v1021_v43 }
 0x2cb   : > { %837 = vmatprep.subr.bf16.mxu0 %v1294_v37 }
 0x2ce   : > { %838 = vmatpush3.bf16.msra.mxu0 %v1022_v44 }
 0x2d1   : > { %840 = vmatmul.mubr.bf16.vlgmr.msra.gmra.mxu0 %v481_v45 }
 0x391   : > { %v587_v47 = vpop.f32.mrf.mxu0 }
 0x392   : > { %v588_v48 = vadd.f32 %v772_v46, %v587_v47 }
 0x393   : > { %v841_v49 = vpop.f32.mrf.mxu0 }
 0x394   : > { %593 = vst [vmem:[%s330_s8] sm:$0xff] %v588_v48 }
 0x395   : > { %v590_v50 = vpop.f32.mrf.mxu0 }
 0x396   : > { %1144 = shalt.err (!%p1141_p13)
}
 0x397   : > { %s1145_s9 = scalar_lea.hbm %s1594_s23, 128  ;;  %s1149_s15 = scalar_lea.hbm %s1731_s0, 1152 }
 0x398   : > { %p1146_p3 = scmp.ne.s32.totalorder %s1594_s23, %s1145_s9  ;;  %p1150_p11 = scmp.lt.s32.totalorder %s1594_s23, %s1731_s0 }
 0x399   : > { %p1151_p8 = scmp.lt.s32.totalorder %s1149_s15, %s1145_s9 }
 0x39a   : > { %p1147_p12 = pnand %p1146_p3, %p1732_p5 }
 0x39b   : > { %p1152_p9 = por %p1151_p8, %p1150_p11 }
 0x39c   : > { %p1148_p1 = pneg %p1147_p12 }
 0x39e   : > { %p1153_p7 = pnand %p1152_p9, %p1148_p1 }
 0x3a0   : > { %1156 = shalt.err (!%p1153_p7)
}
 0x3a1   : > { %856 = dma.vmem_to_hbm [thread:$0]  (%p1732_p5), %s1596_s16, 128, %s1594_s23, %s595_s27   ;;  %v842_v51 = vpop.f32.mrf.mxu0 }
 0x3a2 PF: > { %s1733_s30 = sld [smem:[#allocation16_spill]]  ;;  %p881_p2 = scmp.ge.s32.totalorder %s1283_s6, 2 }
 0x3a3   : > { %s1734_s14 = sld [smem:[#allocation22_spill]] }
 0x3a8   : > { %s622_s26 = sand.u32 1, %s1733_s30  }
 0x3a9   : > { %p1735_p4 = scmp.ne.s32.totalorder %s1734_s14, 0  ;;  %s623_s17 = scalar_lea.sflag [#allocation5], %s622_s26 }
 0x3ab   : > { %p873_p0 = pnand %p881_p2, %p1735_p4 }
 0x3ad   : > { %p874_p6 = pneg %p873_p0 }
 0x3af   : > { %1226 = dma.done.wait (%p874_p6), %s623_s17, 128  }
 0x3b0   : > { %1228 = vsyncadd (%p874_p6), %s623_s17, 4294967168  ;;  %s25_s6 = sadd.s32 1, %s1283_s6   ;;  %s1737_s7 = smov %s1502_s18 }
 0x3b1   : > { %p1627_p10 = scmp.ge.s32.totalorder %s25_s6, 11   ;;  %s1738_s16 = sld [smem:[#allocation17_spill]] }
 0x3b2   : > { %s1739_s23 = sld [smem:[#allocation25_spill]]  ;;  %s1745_s18 = smov %s1235_s19 }
 0x3b3   : > { %s1740_s1 = sld [smem:[#allocation18_spill]]  ;;  %s1746_s19 = smov %s1239_s20 }
 0x3b4   : > { %s1741_s26 = sld [smem:[#allocation26_spill]]  ;;  %s1747_s20 = smov %s1737_s7 }
 0x3b5   : > { %s1742_s28 = sld [smem:[#allocation20_spill]]  ;;  %s1748_s21 = smov %s1247_s22 }
 0x3b6   : > { %s1743_s5 = sld [smem:[#allocation23_spill]]  ;;  %s1750_s24 = smov %s1259_s25 }
 0x3b7   : > { %s1744_s30 = sld [smem:[#allocation24_spill]]  ;;  %s1749_s22 = smov %s1738_s16 }
 0x3b8   : > { %s1752_s27 = smov %s1275_s29  ;;  %24 = sbr.rel (!%p1627_p10) target bundleno = 18 (0x12), region = 113 }
 0x3b9   : > { %s1751_s25 = smov %s1740_s1 }
 0x3bc   : > { %s1753_s29 = smov %s1743_s5 }
 0x3bd   :  { %628 = vsyncpa [#allocation4], 1 }
 0x3be   :  { %630 = vsyncpa [#allocation4 + $0x1], 1 }
 0x3bf   :  { %631 = vsyncpa [#allocation7], 1 }
 0x3c0   :  { %632 = vsyncpa [#allocation10], 1 }
 0x3c1   :  { %634 = vsyncpa [#allocation10 + $0x1], 1 }
 0x3c2   :  { %635 = vsyncpa [#allocation5], 1 }
 0x3c3   :  { %637 = vsyncpa [#allocation5 + $0x1], 1 }

</bundles_post_ra>
